<compile_context>
chip_gen: v5e
topology: v5e:2x2
jax: 0.10.0
libtpu: 0.0.40
codegen_flags: <defaults>
</compile_context>

<pallas_src>
import jax
import jax.numpy as jnp
from jax import lax
from jax.experimental import pallas as pl
from jax.experimental.pallas import tpu as pltpu


def _ceil_to(x, m):
    return ((x + m - 1) // m) * m


def gcn_kernel(a_ref, yhi_ref, ylo_ref, di_ref, o_ref, acc_ref):
    """One (i, k) grid step of  out = d_i^-1/2 * (A_tilde @ Y),
    with Y = (d_j^-1/2 * X) @ W^T pre-computed in the wrapper.

    a_ref   : (tm, tk)  int8  tile of A_tilde (values 0/1/2, exact)
    yhi_ref : (tk, Hp)  bf16  high bf16 half of Y
    ylo_ref : (tk, Hp)  bf16  low (residual) bf16 half of Y  (Y ~= y_hi + y_lo)
    di_ref  : (tm, 1)   f32   d^-1/2 for the output (i) rows
    o_ref   : (tm, Hp)  f32
    acc_ref : (tm, Hp)  f32   VMEM accumulator over the k (reduction) axis
    """
    k = pl.program_id(1)

    @pl.when(k == 0)
    def _():
        acc_ref[...] = jnp.zeros_like(acc_ref)

    # int8 -> bf16 upcast (exact for {0,1,2}).  Two-step via f32 keeps to the
    # most widely supported converts; the VPU has slack so this is hidden.
    a = a_ref[...].astype(jnp.float32).astype(jnp.bfloat16)

    # Two native single-pass bf16 MXU matmuls (hi/lo split of the f32 RHS)
    # instead of one multi-pass f32 matmul; accumulation stays exactly f32.
    acc_ref[...] += (
        jnp.dot(a, yhi_ref[...], preferred_element_type=jnp.float32)
        + jnp.dot(a, ylo_ref[...], preferred_element_type=jnp.float32)
    )

    @pl.when(k == pl.num_programs(1) - 1)
    def _():
        o_ref[...] = acc_ref[...] * di_ref[...]          # row scale d_i^-1/2


def _pick_tiles(num_nodes):
    """Tile sizes (tm, tk, n_pad) with tm | n_pad and tk | n_pad."""
    n_pad = _ceil_to(num_nodes, 128)
    # k (reduction) tile: as large as possible, capped at 1024.
    if n_pad <= 1024:
        tk = n_pad
    else:
        tk = max(t for t in (1024, 512, 256, 128) if n_pad % t == 0)
    # row tile: prefer >=2 row tiles so the "parallel" axis can megacore-split.
    if n_pad == 128:
        tm = 128
    else:
        tm = max((t for t in (512, 256, 128)
                  if n_pad % t == 0 and n_pad // t >= 2), default=128)
    return tm, tk, n_pad


def gcn_conv(x, edge_index, weight):
    """x: (N, F) f32, edge_index: (2, E) int32, weight: (H, F) f32 -> (N, H) f32."""
    num_nodes, node_dim = x.shape
    hidden_dim = weight.shape[0]

    tm, tk, n_pad = _pick_tiles(num_nodes)
    h_pad = _ceil_to(hidden_dim, 128)                    # lane-dense stores

    # --- JAX glue: data-dependent scatter (no clean Pallas equivalent) ------
    # Build A_tilde = A + I directly at its final int8 dtype and padded shape:
    # duplicate edges collapse (set, not add), explicit self-loops become 2.
    src, tgt = edge_index[0], edge_index[1]
    a_pad = jnp.zeros((n_pad, n_pad), jnp.int8).at[src, tgt].set(1)
    diag = jnp.arange(num_nodes)
    a_pad = a_pad.at[diag, diag].add(1)

    # Degrees / D^-1/2 once, from the same int8 array (int32 row sums, exact;
    # no N^2 f32 materialization).  Padded rows get 1 so values stay finite.
    deg = jnp.sum(a_pad, axis=1, dtype=jnp.int32).astype(jnp.float32)
    d_inv_sqrt = jnp.where(deg > 0, lax.rsqrt(deg), 1.0)

    # --- pre-projection:  Y = (d_j^-1/2 * X) @ W^T  (tiny O(N*F*H) GEMM) ----
    # Aggregating at width H keeps the streamed RHS and accumulator lane-dense
    # and removes the finalize matmul.  (For H far beyond one MXU output
    # granule with H >> F a post-projection order would be preferable.)
    y = jnp.dot(x * d_inv_sqrt[:num_nodes, None], weight.T,
                precision=jax.lax.Precision.HIGHEST)
    y_pad = jnp.zeros((n_pad, h_pad), jnp.float32)
    y_pad = y_pad.at[:num_nodes, :hidden_dim].set(y)
    # hi/lo bf16 split: A@(y_hi) + A@(y_lo) reproduces the f32 product to
    # ~2^-18 relative error while both matmuls run as single bf16 MXU passes.
    y_hi = y_pad.astype(jnp.bfloat16)
    y_lo = (y_pad - y_hi.astype(jnp.float32)).astype(jnp.bfloat16)

    dis_pad = d_inv_sqrt.reshape(n_pad, 1)

    out_pad = pl.pallas_call(
        gcn_kernel,
        out_shape=jax.ShapeDtypeStruct((n_pad, h_pad), jnp.float32),
        grid=(n_pad // tm, n_pad // tk),
        in_specs=[
            pl.BlockSpec((tm, tk), lambda i, k: (i, k)),       # A_tilde (int8)
            pl.BlockSpec((tk, h_pad), lambda i, k: (k, 0)),    # y_hi (bf16)
            pl.BlockSpec((tk, h_pad), lambda i, k: (k, 0)),    # y_lo (bf16)
            pl.BlockSpec((tm, 1), lambda i, k: (i, 0)),        # d_i^-1/2
        ],
        out_specs=pl.BlockSpec((tm, h_pad), lambda i, k: (i, 0)),
        scratch_shapes=[pltpu.VMEM((tm, h_pad), jnp.float32)],
        compiler_params=pltpu.CompilerParams(
            dimension_semantics=("parallel", "arbitrary"),
            vmem_limit_bytes=32 * 1024 * 1024),
    )(a_pad, y_hi, y_lo, dis_pad)

    return out_pad[:num_nodes, :hidden_dim]


def gcn_conv_ref(x, edge_index, weight):
    """Pure-JAX reference matching the PyTorch forward."""
    num_nodes = x.shape[0]
    a = jnp.zeros((num_nodes, num_nodes), dtype=jnp.float32)
    a = a.at[edge_index[0], edge_index[1]].set(1.0)
    a_tilde = a + jnp.eye(num_nodes, dtype=jnp.float32)
    d = a_tilde.sum(axis=1)
    d_inv_sqrt = d ** -0.5
    d_tilde = jnp.diag(d_inv_sqrt)
    out = d_tilde @ a_tilde @ d_tilde @ x
    return out @ weight.T


if __name__ == "__main__":
    num_nodes, node_dim, hidden_dim, num_edges = 16, 8, 32, 40

    key = jax.random.PRNGKey(0)
    kx, ke, kw = jax.random.split(key, 3)

    x = jax.random.normal(kx, (num_nodes, node_dim), dtype=jnp.float32)
    edge_index = jax.random.randint(ke, (2, num_edges), 0, num_nodes,
                                    dtype=jnp.int32)
    # nn.Linear(node_dim, hidden_dim, bias=False): weight shape (hidden_dim, node_dim)
    bound = 1.0 / (node_dim ** 0.5)
    weight = jax.random.uniform(kw, (hidden_dim, node_dim), dtype=jnp.float32,
                                minval=-bound, maxval=bound)

    out = gcn_conv(x, edge_index, weight)
    out = jax.block_until_ready(out)

    ref = gcn_conv_ref(x, edge_index, weight)
    assert out.shape == (num_nodes, hidden_dim)
    assert jnp.allclose(out, ref, atol=1e-4, rtol=1e-4), "mismatch vs reference"

    print("KERNEL_OK")
</pallas_src>

<mosaic_0001>
module attributes {stable_mosaic.version = 11 : i64} {
  func.func @gcn_kernel(%arg0: i32, %arg1: i32, %arg2: memref<128x128xi8, #tpu.memory_space<vmem>>, %arg3: memref<128x128xbf16, #tpu.memory_space<vmem>>, %arg4: memref<128x128xbf16, #tpu.memory_space<vmem>>, %arg5: memref<128x1xf32, #tpu.memory_space<vmem>>, %arg6: memref<128x128xf32, #tpu.memory_space<vmem>>, %arg7: memref<128x128xf32, #tpu.memory_space<vmem>>) attributes {dimension_semantics = [#tpu.dimension_semantics<parallel>, #tpu.dimension_semantics<arbitrary>], iteration_bounds = array<i64: 1, 1>, scalar_prefetch = 0 : i64, scratch_operands = 1 : i64, tpu.core_type = #tpu.core_type<tc>, window_params = [{transform_indices = @transform_0, window_bounds = array<i64: 128, 128>}, {transform_indices = @transform_1, window_bounds = array<i64: 128, 128>}, {transform_indices = @transform_2, window_bounds = array<i64: 128, 128>}, {transform_indices = @transform_3, window_bounds = array<i64: 128, 1>}, {transform_indices = @transform_4, window_bounds = array<i64: 128, 128>}]} {
    %c0_i32 = arith.constant 0 : i32
    %0 = arith.cmpi eq, %arg1, %c0_i32 : i32
    %1 = arith.extui %0 : i1 to i32
    %c0_i32_0 = arith.constant 0 : i32
    %2 = arith.cmpi ne, %1, %c0_i32_0 : i32
    scf.if %2 {
      %cst_13 = arith.constant 0.000000e+00 : f32
      %17 = vector.broadcast %cst_13 : f32 to vector<128x128xf32>
      %c0_14 = arith.constant 0 : index
      %c0_15 = arith.constant 0 : index
      %18 = vector.load %arg7[%c0_14, %c0_15] : memref<128x128xf32, #tpu.memory_space<vmem>>, vector<128x128xf32>
      tpu.vector_store %arg7[%c0_14, %c0_15], %17 {strides = array<i32>} : memref<128x128xf32, #tpu.memory_space<vmem>>, vector<128x128xf32>,
    } else {
    }
    %c0 = arith.constant 0 : index
    %c0_1 = arith.constant 0 : index
    %3 = vector.load %arg2[%c0, %c0_1] : memref<128x128xi8, #tpu.memory_space<vmem>>, vector<128x128xi8>
    %4 = arith.sitofp %3 : vector<128x128xi8> to vector<128x128xf32>
    %5 = arith.truncf %4 : vector<128x128xf32> to vector<128x128xbf16>
    %c0_2 = arith.constant 0 : index
    %c0_3 = arith.constant 0 : index
    %6 = vector.load %arg7[%c0_2, %c0_3] : memref<128x128xf32, #tpu.memory_space<vmem>>, vector<128x128xf32>
    %c0_4 = arith.constant 0 : index
    %c0_5 = arith.constant 0 : index
    %7 = vector.load %arg3[%c0_4, %c0_5] : memref<128x128xbf16, #tpu.memory_space<vmem>>, vector<128x128xbf16>
    %cst = arith.constant dense<0.000000e+00> : vector<128x128xf32>
    %8 = tpu.matmul %5, %7, %cst {dimension_numbers = #tpu.dot_dimension_numbers<[1], [0], [0], [1], [0, 0, 1, 1], [], []>} : vector<128x128xbf16>, vector<128x128xbf16>, vector<128x128xf32> -> vector<128x128xf32>
    %c0_6 = arith.constant 0 : index
    %c0_7 = arith.constant 0 : index
    %9 = vector.load %arg4[%c0_6, %c0_7] : memref<128x128xbf16, #tpu.memory_space<vmem>>, vector<128x128xbf16>
    %cst_8 = arith.constant dense<0.000000e+00> : vector<128x128xf32>
    %10 = tpu.matmul %5, %9, %cst_8 {dimension_numbers = #tpu.dot_dimension_numbers<[1], [0], [0], [1], [0, 0, 1, 1], [], []>} : vector<128x128xbf16>, vector<128x128xbf16>, vector<128x128xf32> -> vector<128x128xf32>
    %11 = arith.addf %8, %10 : vector<128x128xf32>
    %12 = arith.addf %6, %11 : vector<128x128xf32>
    %c0_9 = arith.constant 0 : index
    %c0_10 = arith.constant 0 : index
    %13 = vector.load %arg7[%c0_9, %c0_10] : memref<128x128xf32, #tpu.memory_space<vmem>>, vector<128x128xf32>
    tpu.vector_store %arg7[%c0_9, %c0_10], %12 {strides = array<i32>} : memref<128x128xf32, #tpu.memory_space<vmem>>, vector<128x128xf32>,
    %c0_i32_11 = arith.constant 0 : i32
    %14 = arith.cmpi eq, %arg1, %c0_i32_11 : i32
    %15 = arith.extui %14 : i1 to i32
    %c0_i32_12 = arith.constant 0 : i32
    %16 = arith.cmpi ne, %15, %c0_i32_12 : i32
    scf.if %16 {
      %c0_13 = arith.constant 0 : index
      %c0_14 = arith.constant 0 : index
      %17 = vector.load %arg7[%c0_13, %c0_14] : memref<128x128xf32, #tpu.memory_space<vmem>>, vector<128x128xf32>
      %c0_15 = arith.constant 0 : index
      %c0_16 = arith.constant 0 : index
      %18 = vector.load %arg5[%c0_15, %c0_16] : memref<128x1xf32, #tpu.memory_space<vmem>>, vector<128x1xf32>
      %19 = vector.broadcast %18 : vector<128x1xf32> to vector<128x128xf32>
      %20 = arith.mulf %17, %19 : vector<128x128xf32>
      %c0_17 = arith.constant 0 : index
      %c0_18 = arith.constant 0 : index
      %21 = vector.load %arg6[%c0_17, %c0_18] : memref<128x128xf32, #tpu.memory_space<vmem>>, vector<128x128xf32>
      tpu.vector_store %arg6[%c0_17, %c0_18], %20 {strides = array<i32>} : memref<128x128xf32, #tpu.memory_space<vmem>>, vector<128x128xf32>,
    } else {
    }
    return
  }
  func.func @transform_0(%arg0: i32, %arg1: i32) -> (i32, i32) {
    %c0_i32 = arith.constant 0 : i32
    return %arg0, %arg1 : i32, i32
  }
  func.func @transform_1(%arg0: i32, %arg1: i32) -> (i32, i32) {
    %c0_i32 = arith.constant 0 : i32
    %c0_i32_0 = arith.constant 0 : i32
    return %arg1, %c0_i32 : i32, i32
  }
  func.func @transform_2(%arg0: i32, %arg1: i32) -> (i32, i32) {
    %c0_i32 = arith.constant 0 : i32
    %c0_i32_0 = arith.constant 0 : i32
    return %arg1, %c0_i32 : i32, i32
  }
  func.func @transform_3(%arg0: i32, %arg1: i32) -> (i32, i32) {
    %c0_i32 = arith.constant 0 : i32
    %c0_i32_0 = arith.constant 0 : i32
    return %arg0, %c0_i32 : i32, i32
  }
  func.func @transform_4(%arg0: i32, %arg1: i32) -> (i32, i32) {
    %c0_i32 = arith.constant 0 : i32
    %c0_i32_0 = arith.constant 0 : i32
    return %arg0, %c0_i32 : i32, i32
  }
}

</mosaic_0001>

<bundles_post_ra>
// kernel: tpu_custom_call.1
= control target key start
LH: loop header
LB: loop body
LE: loop exit
PB: predicated region body
PF: predicated region fallthrough
CT: control target
= control target key end

     0   :  { %9 = vsyncpa [#allocation4], 0  ;;  %s841_s0 = inlined_call_operand.hbm [shape: s8[128,128], index: 0, kind: input, shape index: {}]   ;;  %s842_s1 = inlined_call_operand.vmem [shape: bf16[128,128], index: 1, kind: input, shape index: {}]   ;;  %s843_s2 = inlined_call_operand.vmem [shape: bf16[128,128], index: 2, kind: input, shape index: {}]   ;;  %s844_s3 = inlined_call_operand.vmem [shape: f32[128,1], index: 3, kind: input, shape index: {}]   ;;  %s845_s4 = inlined_call_operand.hbm [shape: f32[128,128], index: 4, kind: output, shape index: {}]  }
   0x1   :  { %10 = vsyncpa [#allocation5], 0  ;;  %s15_s17 = sshll.u32 %s841_s0, 4  ;;  %s694_s18 = smov [#allocation3]   ;;  %s16_s17 = int_to_ptr.hbm [resolvable:$true] %s15_s17 }
   0x2   :  { %s17_s19 = sshll.u32 %s694_s18, 4  ;;  %s695_s20 = smov 128   ;;  %s18_s19 = int_to_ptr.vmem [resolvable:$true] %s17_s19 }
   0x3   :  { %s696_s21 = smov 8  }
   0x4   :  { %23 = dma.hbm_to_vmem [thread:$0]  %s16_s17, 512, %s18_s19, [#allocation4], %s695_s20, %s695_s20, %s696_s21  }
   0x5   :  { %690 = dma.done.wait [#allocation4], 512  }
   0x6   :  { %691 = vsyncadd [#allocation4], 4294966784  ;;  %v697_v0 = vmov 0   ;;  %v617_v1 = vld [vmem:[%s843_s2 + $0x38] sm:$0xff]  ;;  %v616_v3 = vld [vmem:[%s843_s2 + $0x30] sm:$0xff]  ;;  %s525_s10 = sshll.u32 %s845_s4, 4  ;;  %s526_s10 = int_to_ptr.hbm [resolvable:$true] %s525_s10 }
   0x7   :  { %639 = vset.pattern.permute.xlu0 %v697_v0  ;;  %640 = vset.pattern.permute.xlu1 %v697_v0  ;;  %v609_v2 = vld [vmem:[%s842_s1 + $0x38] sm:$0xff]  ;;  %v608_v4 = vld [vmem:[%s842_s1 + $0x30] sm:$0xff]  ;;  %v391_v5 = vld [vmem:[%s844_s3] sm:$0xff] }
   0x8   :  { %641 = vset.pattern.permute.xlu2 %v697_v0  ;;  %194 = vmatpush.bf16.msra.mxu0 %v617_v1  ;;  %v615_v6 = vld [vmem:[%s843_s2 + $0x28] sm:$0xff]  ;;  %v393_v7 = vld [vmem:[%s844_s3 + $0x10] sm:$0xff]  ;;  %v614_v9 = vld [vmem:[%s843_s2 + $0x20] sm:$0xff] }
   0x9   :  { %618 = vmatpush.bf16.msra.mxu2 %v617_v1  ;;  %291 = vmatpush.bf16.msra.mxu1 %v609_v2  ;;  %v607_v8 = vld [vmem:[%s842_s1 + $0x28] sm:$0xff]  ;;  %v606_v11 = vld [vmem:[%s842_s1 + $0x20] sm:$0xff]  ;;  %v613_v12 = vld [vmem:[%s843_s2 + $0x18] sm:$0xff] }
   0xa   :  { %626 = vmatpush.bf16.msra.mxu3 %v609_v2  ;;  %409 = vperm.xlu0 %639, %v391_v5   ;;  %v392_v10 = vld [vmem:[%s844_s3 + $0x8] sm:$0xff]  ;;  %v605_v13 = vld [vmem:[%s842_s1 + $0x18] sm:$0xff]  ;;  %v612_v14 = vld [vmem:[%s843_s2 + $0x10] sm:$0xff] }
   0xb   :  { %419 = vperm.xlu1 %640, %v393_v7   ;;  %v54_v15 = vld [vmem:[#allocation3] sm:$0xff]  ;;  %v56_v16 = vld [vmem:[#allocation3 + $0x10] sm:$0xff]  ;;  %v394_v18 = vld [vmem:[%s844_s3 + $0x18] sm:$0xff] }
   0xc   :  { %195 = vmatpush.bf16.msra.mxu0 %v616_v3  ;;  %v397_v17 = vld [vmem:[%s844_s3 + $0x30] sm:$0xff]  ;;  %v395_v19 = vld [vmem:[%s844_s3 + $0x20] sm:$0xff]  ;;  %v58_v21 = vunpack.c.0.s8 %v54_v15  ;;  %v59_v22 = vunpack.c.1.s8 %v54_v15  ;;  %v66_v23 = vunpack.c.0.s8 %v56_v16  ;;  %v67_v24 = vunpack.c.1.s8 %v56_v16  ;;  %v611_v25 = vld [vmem:[%s843_s2 + $0x8] sm:$0xff] }
   0xd   :  { %619 = vmatpush.bf16.msra.mxu2 %v616_v3  ;;  %292 = vmatpush.bf16.msra.mxu1 %v608_v4  ;;  %v604_v20 = vld [vmem:[%s842_s1 + $0x10] sm:$0xff]  ;;  %v603_v26 = vld [vmem:[%s842_s1 + $0x8] sm:$0xff]  ;;  %v398_v31 = vld [vmem:[%s844_s3 + $0x38] sm:$0xff]  ;;  %v60_v40 = vunpack.c.2.s8 %v54_v15  ;;  %v61_v41 = vunpack.c.3.s8 %v54_v15  ;;  %v68_v42 = vunpack.c.2.s8 %v56_v16  ;;  %v69_v43 = vunpack.c.3.s8 %v56_v16 }
   0xe   :  { %627 = vmatpush.bf16.msra.mxu3 %v608_v4  ;;  %429 = vperm.xlu2 %641, %v395_v19   ;;  %v74_v27 = vcvt.s32.f32 %v58_v21  ;;  %v75_v28 = vcvt.s32.f32 %v59_v22  ;;  %v82_v29 = vcvt.s32.f32 %v66_v23  ;;  %v83_v30 = vcvt.s32.f32 %v67_v24  ;;  %v610_v32 = vld [vmem:[%s843_s2] sm:$0xff]  ;;  %v400_v33 = vld [vmem:[%s844_s3 + $0x48] sm:$0xff]  ;;  %v401_v39 = vld [vmem:[%s844_s3 + $0x50] sm:$0xff] }
   0xf   :  { %v602_v34 = vld [vmem:[%s842_s1] sm:$0xff]  ;;  %v396_v38 = vld [vmem:[%s844_s3 + $0x28] sm:$0xff]  ;;  %v76_v45 = vcvt.s32.f32 %v60_v40  ;;  %v77_v46 = vcvt.s32.f32 %v61_v41  ;;  %v84_v47 = vcvt.s32.f32 %v68_v42  ;;  %v85_v48 = vcvt.s32.f32 %v69_v43  ;;  %v406_v50 = vld [vmem:[%s844_s3 + $0x78] sm:$0xff] }
  0x10   :  { %196 = vmatpush.bf16.msra.mxu0 %v615_v6  ;;  %v90_v35 = vpack.c.bf16 %v75_v28, %v74_v27  ;;  %v94_v36 = vpack.c.bf16 %v83_v30, %v82_v29  ;;  %v403_v37 = vld [vmem:[%s844_s3 + $0x60] sm:$0xff]  ;;  %v404_v49 = vld [vmem:[%s844_s3 + $0x68] sm:$0xff]  ;;  %v57_v54 = vld [vmem:[#allocation3 + $0x18] sm:$0xff] }
  0x11   :  { %620 = vmatpush.bf16.msra.mxu2 %v615_v6  ;;  %293 = vmatpush.bf16.msra.mxu1 %v607_v8  ;;  %v399_v44 = vld [vmem:[%s844_s3 + $0x40] sm:$0xff]  ;;  %v91_v51 = vpack.c.bf16 %v77_v46, %v76_v45  ;;  %v95_v52 = vpack.c.bf16 %v85_v48, %v84_v47  ;;  %v55_v53 = vld [vmem:[#allocation3 + $0x8] sm:$0xff]  ;;  %v402_v55 = vld [vmem:[%s844_s3 + $0x58] sm:$0xff]  ;;  %v70_v58 = vunpack.c.0.s8 %v57_v54  ;;  %v71_v59 = vunpack.c.1.s8 %v57_v54 }
  0x12   :  { %628 = vmatpush.bf16.msra.mxu3 %v607_v8  ;;  %414 = vperm.xlu0 %639, %v392_v10   ;;  %v62_v56 = vunpack.c.0.s8 %v55_v53  ;;  %v63_v57 = vunpack.c.1.s8 %v55_v53  ;;  %v405_v60 = vld [vmem:[%s844_s3 + $0x70] sm:$0xff]  ;;  %v64_v3 = vunpack.c.2.s8 %v55_v53  ;;  %v65_v4 = vunpack.c.3.s8 %v55_v53  ;;  %s698_s3 = smov [#allocation6]  }
  0x13   :  { %424 = vperm.xlu1 %640, %v394_v18   ;;  %v86_v63 = vcvt.s32.f32 %v70_v58  ;;  %v87_v0 = vcvt.s32.f32 %v71_v59  ;;  %v72_v5 = vunpack.c.2.s8 %v57_v54  ;;  %v73_v6 = vunpack.c.3.s8 %v57_v54  ;;  %s523_s7 = sshll.u32 %s698_s3, 4  ;;  %s524_s7 = int_to_ptr.vmem [resolvable:$true] %s523_s7 }
  0x14   :  { %197 = vmatpush.bf16.msra.mxu0 %v614_v9  ;;  %v78_v61 = vcvt.s32.f32 %v62_v56  ;;  %v79_v62 = vcvt.s32.f32 %v63_v57  ;;  %v80_v7 = vcvt.s32.f32 %v64_v3  ;;  %v81_v8 = vcvt.s32.f32 %v65_v4 }
  0x15   :  { %621 = vmatpush.bf16.msra.mxu2 %v614_v9  ;;  %294 = vmatpush.bf16.msra.mxu1 %v606_v11  ;;  %v96_v2 = vpack.c.bf16 %v87_v0, %v86_v63  ;;  %v88_v9 = vcvt.s32.f32 %v72_v5  ;;  %v89_v10 = vcvt.s32.f32 %v73_v6 }
  0x16   :  { %629 = vmatpush.bf16.msra.mxu3 %v606_v11  ;;  %434 = vperm.xlu2 %641, %v396_v38   ;;  %v92_v1 = vpack.c.bf16 %v79_v62, %v78_v61  ;;  %v93_v11 = vpack.c.bf16 %v81_v8, %v80_v7 }
  0x18   :  { %198 = vmatpush.bf16.msra.mxu0 %v613_v12 }
  0x19   :  { %622 = vmatpush.bf16.msra.mxu2 %v613_v12  ;;  %295 = vmatpush.bf16.msra.mxu1 %v605_v13  ;;  %v97_v12 = vpack.c.bf16 %v89_v10, %v88_v9 }
  0x1a   :  { %630 = vmatpush.bf16.msra.mxu3 %v605_v13  ;;  %439 = vperm.xlu0 %639, %v397_v17  }
  0x1b   :  { %444 = vperm.xlu1 %640, %v398_v31  }
  0x1c   :  { %199 = vmatpush.bf16.msra.mxu0 %v612_v14 }
  0x1d   :  { %623 = vmatpush.bf16.msra.mxu2 %v612_v14  ;;  %296 = vmatpush.bf16.msra.mxu1 %v604_v20 }
  0x1e   :  { %631 = vmatpush.bf16.msra.mxu3 %v604_v20  ;;  %449 = vperm.xlu2 %641, %v399_v44  }
  0x20   :  { %200 = vmatpush.bf16.msra.mxu0 %v611_v25 }
  0x21   :  { %624 = vmatpush.bf16.msra.mxu2 %v611_v25  ;;  %297 = vmatpush.bf16.msra.mxu1 %v603_v26 }
  0x22   :  { %632 = vmatpush.bf16.msra.mxu3 %v603_v26  ;;  %454 = vperm.xlu0 %639, %v400_v33  }
  0x23   :  { %459 = vperm.xlu1 %640, %v401_v39  }
  0x24   :  { %201 = vmatpush.bf16.msra.mxu0 %v610_v32 }
  0x25   :  { %625 = vmatpush.bf16.msra.mxu2 %v610_v32  ;;  %298 = vmatpush.bf16.msra.mxu1 %v602_v34 }
  0x26   :  { %633 = vmatpush.bf16.msra.mxu3 %v602_v34  ;;  %464 = vperm.xlu2 %641, %v402_v55  }
  0x27   :  { %202 = vmatmul.bf16.vlgmr.msra.gmra.mxu0 %v90_v35 }
  0x28   :  { %222 = vmatmul.bf16.vlgmr.msra.gmra.mxu2 %v94_v36  ;;  %299 = vmatmul.bf16.vlgmr.msra.gmra.mxu1 %v90_v35 }
  0x29   :  { %319 = vmatmul.bf16.vlgmr.msra.gmra.mxu3 %v94_v36 }
  0x2a   :  { %469 = vperm.xlu0 %639, %v403_v37  }
  0x2b   :  { %474 = vperm.xlu1 %640, %v404_v49  }
  0x2e   :  { %479 = vperm.xlu2 %641, %v405_v60  }
  0x32   :  { %484 = vperm.xlu0 %639, %v406_v50  }
  0x37   :  { %207 = vmatmul.bf16.gmra.mxu0 %v91_v51 }
  0x38   :  { %227 = vmatmul.bf16.gmra.mxu2 %v95_v52  ;;  %304 = vmatmul.bf16.gmra.mxu1 %v91_v51 }
  0x39   :  { %324 = vmatmul.bf16.gmra.mxu3 %v95_v52 }
  0x47   :  { %212 = vmatmul.bf16.gmra.mxu0 %v92_v1 }
  0x48   :  { %232 = vmatmul.bf16.gmra.mxu2 %v96_v2  ;;  %309 = vmatmul.bf16.gmra.mxu1 %v92_v1 }
  0x49   :  { %329 = vmatmul.bf16.gmra.mxu3 %v96_v2 }
  0x57   :  { %217 = vmatmul.bf16.gmra.mxu0 %v93_v11 }
  0x58   :  { %237 = vmatmul.bf16.gmra.mxu2 %v97_v12  ;;  %314 = vmatmul.bf16.gmra.mxu1 %v93_v11 }
  0x59   :  { %334 = vmatmul.bf16.gmra.mxu3 %v97_v12 }
  0x68   :  { %v430_v13 = vpop.permute.xlu2 %429 }
  0x70   :  { %v826_v16 = vpop.permute.xlu2 %434 }
  0x78   :  { %v450_v24 = vpop.permute.xlu2 %449 }
  0x7c   :  { %v410_v14 = vpop.permute.xlu0 %409 }
  0x7d   :  { %v420_v15 = vpop.permute.xlu1 %419 }
  0x80   :  { %v465_v56 = vpop.permute.xlu2 %464 }
  0x84   :  { %v415_v17 = vpop.permute.xlu0 %414 }
  0x85   :  { %v425_v21 = vpop.permute.xlu1 %424 }
  0x8c   :  { %v828_v25 = vpop.permute.xlu0 %439 }
  0x8d   :  { %v830_v33 = vpop.permute.xlu1 %444 }
  0x94   :  { %v455_v38 = vpop.permute.xlu0 %454 }
  0x95   :  { %v460_v45 = vpop.permute.xlu1 %459 }
  0x9c   :  { %v470_v1 = vpop.permute.xlu0 %469 }
  0x9d   :  { %v475_v10 = vpop.permute.xlu1 %474 }
  0xa4   :  { %v203_v18 = vpop.f32.mrf.mxu0 }
  0xa5   :  { %v300_v19 = vpop.f32.mrf.mxu1 }
  0xa6   :  { %v301_v20 = vadd.f32 %v300_v19, %v203_v18 }
  0xa8   :  { %v487_v22 = vmul.f32 %v410_v14, %v301_v20  ;;  %v480_v20 = vpop.permute.xlu2 %479 }
  0xaa   :  { %503 = vst [vmem:[#allocation6] sm:$0xff] %v487_v22 }
  0xab   :  { %v223_v23 = vpop.f32.mrf.mxu2 }
  0xac   :  { %v320_v26 = vpop.f32.mrf.mxu3  ;;  %v205_v28 = vpop.f32.mrf.mxu0 }
  0xad   :  { %v321_v27 = vadd.f32 %v320_v26, %v223_v23  ;;  %v302_v29 = vpop.f32.mrf.mxu1 }
  0xae   :  { %v303_v31 = vadd.f32 %v302_v29, %v205_v28 }
  0xaf   :  { %v495_v30 = vmul.f32 %v450_v24, %v321_v27  ;;  %v485_v27 = vpop.permute.xlu0 %484 }
  0xb0   :  { %v488_v32 = vmul.f32 %v415_v17, %v303_v31 }
  0xb1   :  { %511 = vst [vmem:[#allocation6 + $0x40] sm:$0xff] %v495_v30 }
  0xb2   :  { %504 = vst [vmem:[#allocation6 + $0x8] sm:$0xff] %v488_v32 }
  0xb3   :  { %v225_v34 = vpop.f32.mrf.mxu2 }
  0xb4   :  { %v322_v35 = vpop.f32.mrf.mxu3  ;;  %v208_v37 = vpop.f32.mrf.mxu0 }
  0xb5   :  { %v323_v36 = vadd.f32 %v322_v35, %v225_v34  ;;  %v305_v39 = vpop.f32.mrf.mxu1 }
  0xb6   :  { %v306_v41 = vadd.f32 %v305_v39, %v208_v37 }
  0xb7   :  { %v496_v40 = vmul.f32 %v455_v38, %v323_v36 }
  0xb8   :  { %v489_v42 = vmul.f32 %v420_v15, %v306_v41 }
  0xb9   :  { %512 = vst [vmem:[#allocation6 + $0x48] sm:$0xff] %v496_v40 }
  0xba   :  { %505 = vst [vmem:[#allocation6 + $0x10] sm:$0xff] %v489_v42 }
  0xbb   :  { %v228_v43 = vpop.f32.mrf.mxu2 }
  0xbc   :  { %v325_v44 = vpop.f32.mrf.mxu3  ;;  %v210_v47 = vpop.f32.mrf.mxu0 }
  0xbd   :  { %v326_v46 = vadd.f32 %v325_v44, %v228_v43  ;;  %v307_v48 = vpop.f32.mrf.mxu1 }
  0xbe   :  { %v308_v50 = vadd.f32 %v307_v48, %v210_v47 }
  0xbf   :  { %v497_v49 = vmul.f32 %v460_v45, %v326_v46 }
  0xc0   :  { %v490_v51 = vmul.f32 %v425_v21, %v308_v50 }
  0xc1   :  { %513 = vst [vmem:[#allocation6 + $0x50] sm:$0xff] %v497_v49 }
  0xc2   :  { %506 = vst [vmem:[#allocation6 + $0x18] sm:$0xff] %v490_v51 }
  0xc3   :  { %v230_v52 = vpop.f32.mrf.mxu2 }
  0xc4   :  { %v327_v53 = vpop.f32.mrf.mxu3  ;;  %v213_v55 = vpop.f32.mrf.mxu0 }
  0xc5   :  { %v328_v54 = vadd.f32 %v327_v53, %v230_v52  ;;  %v310_v57 = vpop.f32.mrf.mxu1 }
  0xc6   :  { %v311_v59 = vadd.f32 %v310_v57, %v213_v55 }
  0xc7   :  { %v498_v58 = vmul.f32 %v465_v56, %v328_v54 }
  0xc8   :  { %v491_v60 = vmul.f32 %v430_v13, %v311_v59 }
  0xc9   :  { %514 = vst [vmem:[#allocation6 + $0x58] sm:$0xff] %v498_v58 }
  0xca   :  { %507 = vst [vmem:[#allocation6 + $0x20] sm:$0xff] %v491_v60 }
  0xcb   :  { %v233_v61 = vpop.f32.mrf.mxu2 }
  0xcc   :  { %v330_v62 = vpop.f32.mrf.mxu3  ;;  %v215_v0 = vpop.f32.mrf.mxu0 }
  0xcd   :  { %v331_v63 = vadd.f32 %v330_v62, %v233_v61  ;;  %v312_v2 = vpop.f32.mrf.mxu1 }
  0xce   :  { %v313_v4 = vadd.f32 %v312_v2, %v215_v0 }
  0xcf   :  { %v499_v3 = vmul.f32 %v470_v1, %v331_v63 }
  0xd0   :  { %v492_v5 = vmul.f32 %v826_v16, %v313_v4 }
  0xd1   :  { %515 = vst [vmem:[#allocation6 + $0x60] sm:$0xff] %v499_v3 }
  0xd2   :  { %508 = vst [vmem:[#allocation6 + $0x28] sm:$0xff] %v492_v5 }
  0xd3   :  { %v235_v6 = vpop.f32.mrf.mxu2 }
  0xd4   :  { %v332_v7 = vpop.f32.mrf.mxu3  ;;  %v218_v9 = vpop.f32.mrf.mxu0 }
  0xd5   :  { %v333_v8 = vadd.f32 %v332_v7, %v235_v6  ;;  %v315_v11 = vpop.f32.mrf.mxu1 }
  0xd6   :  { %v316_v13 = vadd.f32 %v315_v11, %v218_v9 }
  0xd7   :  { %v500_v12 = vmul.f32 %v475_v10, %v333_v8 }
  0xd8   :  { %v493_v14 = vmul.f32 %v828_v25, %v316_v13 }
  0xd9   :  { %516 = vst [vmem:[#allocation6 + $0x68] sm:$0xff] %v500_v12 }
  0xda   :  { %509 = vst [vmem:[#allocation6 + $0x30] sm:$0xff] %v493_v14 }
  0xdb   :  { %v238_v15 = vpop.f32.mrf.mxu2 }
  0xdc   :  { %v335_v17 = vpop.f32.mrf.mxu3  ;;  %v220_v19 = vpop.f32.mrf.mxu0 }
  0xdd   :  { %v336_v18 = vadd.f32 %v335_v17, %v238_v15  ;;  %v317_v21 = vpop.f32.mrf.mxu1 }
  0xde   :  { %v318_v22 = vadd.f32 %v317_v21, %v220_v19 }
  0xdf   :  { %v501_v16 = vmul.f32 %v480_v20, %v336_v18 }
  0xe0   :  { %v494_v23 = vmul.f32 %v830_v33, %v318_v22 }
  0xe1   :  { %517 = vst [vmem:[#allocation6 + $0x70] sm:$0xff] %v501_v16 }
  0xe2   :  { %510 = vst [vmem:[#allocation6 + $0x38] sm:$0xff] %v494_v23 }
  0xe3   :  { %v240_v24 = vpop.f32.mrf.mxu2 }
  0xe4   :  { %v337_v26 = vpop.f32.mrf.mxu3 }
  0xe5   :  { %v338_v25 = vadd.f32 %v337_v26, %v240_v24 }
  0xe7   :  { %v502_v28 = vmul.f32 %v485_v27, %v338_v25 }
  0xe9   :  { %518 = vst [vmem:[#allocation6 + $0x78] sm:$0xff] %v502_v28 }
  0xea   :  { %531 = dma.vmem_to_hbm [thread:$0]  %s524_s7, 2048, %s526_s10, [#allocation5], %s695_s20, %s695_s20, %s696_s21  }
  0xeb   :  { %692 = dma.done.wait [#allocation5], 2048  }
  0xec   :  { %693 = vsyncadd [#allocation5], 4294965248 }
  0xed   :  { %536 = vsyncpa [#allocation4], 1 }
  0xee   :  { %537 = vsyncpa [#allocation5], 1 }

</bundles_post_ra>
